<compile_context>
chip_gen: v7x
topology: tpu7x:2x2x1
jax: 0.10.0
libtpu: 0.0.40
codegen_flags: <defaults>
</compile_context>

<pallas_src>
import jax
import jax.numpy as jnp
import numpy as np
from jax.experimental import pallas as pl
from jax.experimental.pallas import tpu as pltpu


def _round_up(v, m):
    return ((v + m - 1) // m) * m


def _tree_gru_kernel(inv_ref, x_ref, h_ref, hrh_ref,
                     w_zrwx_ref, w_zh_ref, b_zh_ref, w_wh_ref, b_wh_ref,
                     out_ref, hsum_scr, rhsum_scr, zrwx_scr):
    tp, h_pad = out_ref.shape          # parents in this tile, padded hidden
    n_cc = h_ref.shape[0]              # children in this chunk
    i = pl.program_id(0)               # parent-tile index   (parallel)
    k = pl.program_id(1)               # child-chunk index   (arbitrary / reduction)
    n_k = pl.num_programs(1)

    @pl.when(k == 0)
    def _():
        hsum_scr[...] = jnp.zeros_like(hsum_scr)
        rhsum_scr[...] = jnp.zeros_like(rhsum_scr)
        # fused zrwx input projection, computed once per parent tile
        zrwx_scr[...] = jnp.dot(x_ref[...], w_zrwx_ref[...],
                                preferred_element_type=jnp.float32)

    # one-hot segment matrix for (this parent tile) x (this child chunk)
    base = i * tp
    rows = jax.lax.broadcasted_iota(jnp.int32, (tp, n_cc), 0) + base
    inv = inv_ref[...]                                          # [1, n_cc]
    seg = (jnp.broadcast_to(inv, (tp, n_cc)) == rows).astype(jnp.float32)

    h = h_ref[...]                                              # [n_cc, H]
    # h_sum accumulation (sum_idx_ restricted to this tile/chunk)
    hsum_scr[...] += jnp.dot(seg, h, preferred_element_type=jnp.float32)

    # repeat_idx_(rx, tree_idx): gather rx onto children by reusing seg with a
    # transposed contraction (contract the parent axis) -> no second one-hot.
    rx = zrwx_scr[:, h_pad:2 * h_pad]                           # [tp, H]
    rx_rep = jax.lax.dot_general(
        seg, rx, dimension_numbers=(((0,), (0,)), ((), ())),
        preferred_element_type=jnp.float32)                     # [n_cc, H]

    # r = sigmoid(rh(h) + rx_rep); rh(h)+b_rh was hoisted to the wrapper.
    r = jax.nn.sigmoid(hrh_ref[...] + rx_rep)
    rhsum_scr[...] += jnp.dot(seg, r * h, preferred_element_type=jnp.float32)

    @pl.when(k == n_k - 1)
    def _():
        zx = zrwx_scr[:, 0:h_pad]
        wx = zrwx_scr[:, 2 * h_pad:3 * h_pad]
        h_sum = hsum_scr[...]
        z = jax.nn.sigmoid(
            jnp.dot(h_sum, w_zh_ref[...], preferred_element_type=jnp.float32)
            + b_zh_ref[...] + zx)
        h_hat = jnp.tanh(
            jnp.dot(rhsum_scr[...], w_wh_ref[...], preferred_element_type=jnp.float32)
            + b_wh_ref[...] + wx)
        out_ref[...] = (1.0 - z) * h_sum + z * h_hat


def make_params(key, embedding_size, hidden_size):
    """Raw PyTorch-Linear-style parameters (zrwx fused: [E, 3H], no bias)."""
    ks = jax.random.split(key, 7)

    def w(k, fan_in, fan_out):
        bound = 1.0 / np.sqrt(fan_in)
        return jax.random.uniform(k, (fan_in, fan_out), jnp.float32, -bound, bound)

    def b(k, fan_in, fan_out):
        bound = 1.0 / np.sqrt(fan_in)
        return jax.random.uniform(k, (1, fan_out), jnp.float32, -bound, bound)

    return dict(
        w_zrwx=w(ks[0], embedding_size, 3 * hidden_size),
        w_zh=w(ks[1], hidden_size, hidden_size), b_zh=b(ks[2], hidden_size, hidden_size),
        w_rh=w(ks[3], hidden_size, hidden_size), b_rh=b(ks[4], hidden_size, hidden_size),
        w_wh=w(ks[5], hidden_size, hidden_size), b_wh=b(ks[6], hidden_size, hidden_size),
    )


def pad_params(params, embedding_size, hidden_size):
    """Lane-dense zero padding, done ONCE (hoisted out of the forward)."""
    h_pad = _round_up(hidden_size, 128)
    e_pad = _round_up(embedding_size, 128)

    # fused zrwx: each H-wide block placed at a 128-aligned column offset
    w_zrwx = jnp.zeros((e_pad, 3 * h_pad), jnp.float32)
    for blk in range(3):
        w_zrwx = w_zrwx.at[
            :embedding_size, blk * h_pad:blk * h_pad + hidden_size].set(
            params["w_zrwx"][:, blk * hidden_size:(blk + 1) * hidden_size])

    def pad_w(w_arr):
        return jnp.zeros((h_pad, h_pad), jnp.float32).at[
            :hidden_size, :hidden_size].set(w_arr)

    def pad_b(b_arr):
        return jnp.zeros((1, h_pad), jnp.float32).at[:, :hidden_size].set(
            jnp.reshape(b_arr, (1, -1)))

    return dict(
        hidden_size=hidden_size, embedding_size=embedding_size,
        h_pad=h_pad, e_pad=e_pad,
        w_zrwx=w_zrwx,
        w_zh=pad_w(params["w_zh"]), b_zh=pad_b(params["b_zh"]),
        w_rh=pad_w(params["w_rh"]), b_rh=pad_b(params["b_rh"]),
        w_wh=pad_w(params["w_wh"]), b_wh=pad_b(params["b_wh"]),
    )


def _index_glue(h, hx, tree_idx, hidden_idx, hidden_size):
    """Device-side replace_idx_ scatter + unique_consecutive inverse ids."""
    n_children = tree_idx.shape[0]
    diff = (tree_idx[1:] != tree_idx[:-1]).astype(jnp.int32)
    inv = jnp.concatenate([jnp.zeros((1,), jnp.int32), jnp.cumsum(diff)])
    h_full = jnp.broadcast_to(
        jnp.reshape(hx[0].astype(jnp.float32), (1, hidden_size)),
        (n_children, hidden_size))
    if hidden_idx.shape[0] > 0:
        h_full = h_full.at[hidden_idx].set(h.astype(jnp.float32))
    return h_full, inv


def child_sum_tree_gru_forward(x, h, c, hx, tree_idx, hidden_idx, padded_params,
                               parent_tile=256, child_chunk=512):
    """Pallas forward of ChildSumTreeGRUCell.forward; returns (h_new, None).

    NOTE: assumes x.shape[0] equals the number of consecutive groups in
    tree_idx (unique_consecutive count), matching the PyTorch module's usage.
    parent_tile: 256 suits v6e/v7x MXU rows; 128 is enough on v5e (4x128^2 MXU).
    """
    del c  # unused by the reference module
    hidden_size = padded_params["hidden_size"]
    emb_size = padded_params["embedding_size"]
    h_pad = padded_params["h_pad"]
    e_pad = padded_params["e_pad"]
    n_par = x.shape[0]
    n_ch = tree_idx.shape[0]

    h_full, inv = _index_glue(h, hx, tree_idx, hidden_idx, hidden_size)

    # ---- tiling: parents tiled (parallel), children chunked (reduction) ----
    tp = min(parent_tile, _round_up(max(n_par, 1), 8))
    np_pad = _round_up(max(n_par, 1), tp)
    if np_pad // tp < 2 and tp > 8:
        # keep >=2 parent tiles when possible so v7x megacore can split work
        tp = max(8, _round_up((n_par + 1) // 2, 8))
        np_pad = _round_up(n_par, tp)
    cc = min(child_chunk, _round_up(max(n_ch, 1), 128))
    nc_pad = _round_up(max(n_ch, 1), cc)
    n_ptiles = np_pad // tp
    n_chunks = nc_pad // cc

    # ---- lane-dense padded operands (feature dims already padded x128) ----
    x_p = jnp.zeros((np_pad, e_pad), jnp.float32).at[:n_par, :emb_size].set(
        x.astype(jnp.float32))
    h_p = jnp.zeros((nc_pad, h_pad), jnp.float32).at[:n_ch, :hidden_size].set(h_full)
    inv_p = jnp.full((1, nc_pad), -1, jnp.int32).at[0, :n_ch].set(inv)

    # hoisted tile-invariant projection: rh(h) + b_rh, computed once per call
    hrh_p = h_p @ padded_params["w_rh"] + padded_params["b_rh"]

    w_zrwx = padded_params["w_zrwx"]
    w_zh, b_zh = padded_params["w_zh"], padded_params["b_zh"]
    w_wh, b_wh = padded_params["w_wh"], padded_params["b_wh"]

    grid = (n_ptiles, n_chunks)

    def full(shape):
        return pl.BlockSpec(shape, lambda i, k: (0, 0))

    cost = pl.CostEstimate(
        flops=int(2 * np_pad * e_pad * 3 * h_pad          # fused zrwx
                  + 6 * np_pad * nc_pad * h_pad           # three seg matmuls
                  + 4 * np_pad * h_pad * h_pad),          # zh / wh gates
        transcendentals=int(n_ptiles * nc_pad * h_pad + 2 * np_pad * h_pad),
        bytes_accessed=int(4 * (x_p.size + (h_p.size + hrh_p.size) * n_ptiles
                                + w_zrwx.size + 2 * h_pad * h_pad
                                + np_pad * h_pad)),
    )

    out_p = pl.pallas_call(
        _tree_gru_kernel,
        out_shape=jax.ShapeDtypeStruct((np_pad, h_pad), jnp.float32),
        grid=grid,
        in_specs=[
            pl.BlockSpec((1, cc), lambda i, k: (0, k)),        # inverse ids chunk
            pl.BlockSpec((tp, e_pad), lambda i, k: (i, 0)),    # x parent tile
            pl.BlockSpec((cc, h_pad), lambda i, k: (k, 0)),    # h child chunk
            pl.BlockSpec((cc, h_pad), lambda i, k: (k, 0)),    # hoisted rh(h)+b chunk
            full((e_pad, 3 * h_pad)),                          # fused zrwx weight
            full((h_pad, h_pad)), full((1, h_pad)),            # zh
            full((h_pad, h_pad)), full((1, h_pad)),            # wh
        ],
        out_specs=pl.BlockSpec((tp, h_pad), lambda i, k: (i, 0)),
        scratch_shapes=[
            pltpu.VMEM((tp, h_pad), jnp.float32),              # h_sum accumulator
            pltpu.VMEM((tp, h_pad), jnp.float32),              # rh_sum accumulator
            pltpu.VMEM((tp, 3 * h_pad), jnp.float32),          # cached zrwx(x) tile
        ],
        compiler_params=pltpu.CompilerParams(
            dimension_semantics=("parallel", "arbitrary"),
            vmem_limit_bytes=48 * 1024 * 1024),
        cost_estimate=cost,
    )(inv_p, x_p, h_p, hrh_p, w_zrwx, w_zh, b_zh, w_wh, b_wh)

    return out_p[:n_par, :hidden_size], None


def reference_forward(x, h, c, hx, tree_idx, hidden_idx, params, hidden_size):
    """Pure-JAX reference mirroring the PyTorch semantics (raw params)."""
    del c
    n_par = x.shape[0]
    h_full, inv = _index_glue(h, hx, tree_idx, hidden_idx, hidden_size)

    h_sum = jax.ops.segment_sum(h_full, inv, num_segments=n_par)
    zrwx = x @ params["w_zrwx"]
    zx = zrwx[:, 0:hidden_size]
    rx = zrwx[:, hidden_size:2 * hidden_size]
    wx = zrwx[:, 2 * hidden_size:3 * hidden_size]
    z = jax.nn.sigmoid(h_sum @ params["w_zh"] + params["b_zh"] + zx)
    r = jax.nn.sigmoid(h_full @ params["w_rh"] + params["b_rh"] + rx[inv])
    rsum = jax.ops.segment_sum(r * h_full, inv, num_segments=n_par)
    h_hat = jnp.tanh(rsum @ params["w_wh"] + params["b_wh"] + wx)
    return (1.0 - z) * h_sum + z * h_hat


if __name__ == "__main__":
    key = jax.random.PRNGKey(0)
    embedding_size, hidden_size = 16, 32

    # 8 children grouped consecutively into 3 parent nodes (unique_consecutive)
    tree_idx = jnp.asarray([5, 5, 5, 9, 9, 12, 12, 12], dtype=jnp.int32)
    # 3 of the children already carry a computed hidden state
    hidden_idx = jnp.asarray([1, 3, 6], dtype=jnp.int32)
    n_parents = 3

    kx, kh, kp = jax.random.split(key, 3)
    x = jax.random.normal(kx, (n_parents, embedding_size), jnp.float32)
    h = jax.random.normal(kh, (hidden_idx.shape[0], hidden_size), jnp.float32)
    hx = (jnp.zeros((hidden_size,), jnp.float32), jnp.zeros((hidden_size,), jnp.float32))
    c = None

    params_raw = make_params(kp, embedding_size, hidden_size)
    # padding hoisted out of the forward: done once, reused every call
    params_pad = pad_params(params_raw, embedding_size, hidden_size)

    out, _ = child_sum_tree_gru_forward(x, h, c, hx, tree_idx, hidden_idx, params_pad)
    out = jax.block_until_ready(out)

    ref = reference_forward(x, h, c, hx, tree_idx, hidden_idx, params_raw, hidden_size)
    assert out.shape == (n_parents, hidden_size)
    np.testing.assert_allclose(np.asarray(out), np.asarray(ref), rtol=1e-5, atol=1e-5)
    print("KERNEL_OK")
</pallas_src>

<mosaic_0001>
module attributes {stable_mosaic.version = 11 : i64} {
  func.func @_tree_gru_kernel(%arg0: i32, %arg1: i32, %arg2: memref<1x128xi32, #tpu.memory_space<vmem>>, %arg3: memref<8x128xf32, #tpu.memory_space<vmem>>, %arg4: memref<128x128xf32, #tpu.memory_space<vmem>>, %arg5: memref<128x128xf32, #tpu.memory_space<vmem>>, %arg6: memref<128x384xf32, #tpu.memory_space<vmem>>, %arg7: memref<128x128xf32, #tpu.memory_space<vmem>>, %arg8: memref<1x128xf32, #tpu.memory_space<vmem>>, %arg9: memref<128x128xf32, #tpu.memory_space<vmem>>, %arg10: memref<1x128xf32, #tpu.memory_space<vmem>>, %arg11: memref<8x128xf32, #tpu.memory_space<vmem>>, %arg12: memref<8x128xf32, #tpu.memory_space<vmem>>, %arg13: memref<8x128xf32, #tpu.memory_space<vmem>>, %arg14: memref<8x384xf32, #tpu.memory_space<vmem>>) attributes {dimension_semantics = [#tpu.dimension_semantics<parallel>, #tpu.dimension_semantics<arbitrary>], iteration_bounds = array<i64: 1, 1>, scalar_prefetch = 0 : i64, scratch_operands = 3 : i64, tpu.core_type = #tpu.core_type<tc>, window_params = [{transform_indices = @transform_0, window_bounds = array<i64: 1, 128>}, {transform_indices = @transform_1, window_bounds = array<i64: 8, 128>}, {transform_indices = @transform_2, window_bounds = array<i64: 128, 128>}, {transform_indices = @transform_3, window_bounds = array<i64: 128, 128>}, {pipeline_mode = #tpu.pipeline_mode<synchronous>, transform_indices = @transform_4, window_bounds = array<i64: 128, 384>}, {pipeline_mode = #tpu.pipeline_mode<synchronous>, transform_indices = @transform_5, window_bounds = array<i64: 128, 128>}, {pipeline_mode = #tpu.pipeline_mode<synchronous>, transform_indices = @transform_6, window_bounds = array<i64: 1, 128>}, {pipeline_mode = #tpu.pipeline_mode<synchronous>, transform_indices = @transform_7, window_bounds = array<i64: 128, 128>}, {pipeline_mode = #tpu.pipeline_mode<synchronous>, transform_indices = @transform_8, window_bounds = array<i64: 1, 128>}, {transform_indices = @transform_9, window_bounds = array<i64: 8, 128>}]} {
    %c0_i32 = arith.constant 0 : i32
    %0 = arith.cmpi eq, %arg1, %c0_i32 : i32
    %1 = arith.extui %0 : i1 to i32
    %c0_i32_0 = arith.constant 0 : i32
    %2 = arith.cmpi ne, %1, %c0_i32_0 : i32
    scf.if %2 {
      %cst_20 = arith.constant 0.000000e+00 : f32
      %35 = vector.broadcast %cst_20 : f32 to vector<8x128xf32>
      %c0_21 = arith.constant 0 : index
      %c0_22 = arith.constant 0 : index
      %36 = vector.load %arg12[%c0_21, %c0_22] : memref<8x128xf32, #tpu.memory_space<vmem>>, vector<8x128xf32>
      tpu.vector_store %arg12[%c0_21, %c0_22], %35 {strides = array<i32>} : memref<8x128xf32, #tpu.memory_space<vmem>>, vector<8x128xf32>,
      %cst_23 = arith.constant 0.000000e+00 : f32
      %37 = vector.broadcast %cst_23 : f32 to vector<8x128xf32>
      %c0_24 = arith.constant 0 : index
      %c0_25 = arith.constant 0 : index
      %38 = vector.load %arg13[%c0_24, %c0_25] : memref<8x128xf32, #tpu.memory_space<vmem>>, vector<8x128xf32>
      tpu.vector_store %arg13[%c0_24, %c0_25], %37 {strides = array<i32>} : memref<8x128xf32, #tpu.memory_space<vmem>>, vector<8x128xf32>,
      %c0_26 = arith.constant 0 : index
      %c0_27 = arith.constant 0 : index
      %39 = vector.load %arg3[%c0_26, %c0_27] : memref<8x128xf32, #tpu.memory_space<vmem>>, vector<8x128xf32>
      %c0_28 = arith.constant 0 : index
      %c0_29 = arith.constant 0 : index
      %40 = vector.load %arg6[%c0_28, %c0_29] : memref<128x384xf32, #tpu.memory_space<vmem>>, vector<128x384xf32>
      %cst_30 = arith.constant dense<0.000000e+00> : vector<8x384xf32>
      %41 = tpu.matmul %39, %40, %cst_30 {dimension_numbers = #tpu.dot_dimension_numbers<[1], [0], [0], [1], [0, 0, 1, 1], [], []>} : vector<8x128xf32>, vector<128x384xf32>, vector<8x384xf32> -> vector<8x384xf32>
      %c0_31 = arith.constant 0 : index
      %c0_32 = arith.constant 0 : index
      %42 = vector.load %arg14[%c0_31, %c0_32] : memref<8x384xf32, #tpu.memory_space<vmem>>, vector<8x384xf32>
      tpu.vector_store %arg14[%c0_31, %c0_32], %41 {strides = array<i32>} : memref<8x384xf32, #tpu.memory_space<vmem>>, vector<8x384xf32>,
    } else {
    }
    %c8_i32 = arith.constant 8 : i32
    %3 = arith.muli %arg0, %c8_i32 : i32
    %4 = tpu.iota {dimensions = array<i32: 0>} : vector<8x128xi32>
    %5 = vector.broadcast %3 : i32 to vector<8x128xi32>
    %6 = arith.addi %4, %5 : vector<8x128xi32>
    %c0 = arith.constant 0 : index
    %c0_1 = arith.constant 0 : index
    %7 = vector.load %arg2[%c0, %c0_1] : memref<1x128xi32, #tpu.memory_space<vmem>>, vector<1x128xi32>
    %8 = vector.shape_cast %7 : vector<1x128xi32> to vector<1x128xi32>
    %9 = vector.broadcast %8 : vector<1x128xi32> to vector<8x128xi32>
    %10 = arith.cmpi eq, %9, %6 : vector<8x128xi32>
    %11 = arith.extui %10 : vector<8x128xi1> to vector<8x128xi32>
    %12 = arith.sitofp %11 : vector<8x128xi32> to vector<8x128xf32>
    %c0_2 = arith.constant 0 : index
    %c0_3 = arith.constant 0 : index
    %13 = vector.load %arg4[%c0_2, %c0_3] : memref<128x128xf32, #tpu.memory_space<vmem>>, vector<128x128xf32>
    %c0_4 = arith.constant 0 : index
    %c0_5 = arith.constant 0 : index
    %14 = vector.load %arg12[%c0_4, %c0_5] : memref<8x128xf32, #tpu.memory_space<vmem>>, vector<8x128xf32>
    %cst = arith.constant dense<0.000000e+00> : vector<8x128xf32>
    %15 = tpu.matmul %12, %13, %cst {dimension_numbers = #tpu.dot_dimension_numbers<[1], [0], [0], [1], [0, 0, 1, 1], [], []>} : vector<8x128xf32>, vector<128x128xf32>, vector<8x128xf32> -> vector<8x128xf32>
    %16 = arith.addf %14, %15 : vector<8x128xf32>
    %c0_6 = arith.constant 0 : index
    %c0_7 = arith.constant 0 : index
    %17 = vector.load %arg12[%c0_6, %c0_7] : memref<8x128xf32, #tpu.memory_space<vmem>>, vector<8x128xf32>
    tpu.vector_store %arg12[%c0_6, %c0_7], %16 {strides = array<i32>} : memref<8x128xf32, #tpu.memory_space<vmem>>, vector<8x128xf32>,
    %c0_8 = arith.constant 0 : index
    %c128 = arith.constant 128 : index
    %18 = vector.load %arg14[%c0_8, %c128] : memref<8x384xf32, #tpu.memory_space<vmem>>, vector<8x128xf32>
    %cst_9 = arith.constant dense<0.000000e+00> : vector<128x128xf32>
    %19 = tpu.matmul %12, %18, %cst_9 {dimension_numbers = #tpu.dot_dimension_numbers<[0], [0], [1], [1], [0, 1, 1, 1], [], []>} : vector<8x128xf32>, vector<8x128xf32>, vector<128x128xf32> -> vector<128x128xf32>
    %c0_10 = arith.constant 0 : index
    %c0_11 = arith.constant 0 : index
    %20 = vector.load %arg5[%c0_10, %c0_11] : memref<128x128xf32, #tpu.memory_space<vmem>>, vector<128x128xf32>
    %21 = arith.addf %20, %19 : vector<128x128xf32>
    %22 = arith.negf %21 : vector<128x128xf32>
    %23 = math.exp %22 : vector<128x128xf32>
    %cst_12 = arith.constant 1.000000e+00 : f32
    %24 = vector.broadcast %cst_12 : f32 to vector<128x128xf32>
    %25 = arith.addf %24, %23 : vector<128x128xf32>
    %26 = arith.divf %24, %25 : vector<128x128xf32>
    %c0_13 = arith.constant 0 : index
    %c0_14 = arith.constant 0 : index
    %27 = vector.load %arg13[%c0_13, %c0_14] : memref<8x128xf32, #tpu.memory_space<vmem>>, vector<8x128xf32>
    %28 = arith.mulf %26, %13 : vector<128x128xf32>
    %cst_15 = arith.constant dense<0.000000e+00> : vector<8x128xf32>
    %29 = tpu.matmul %12, %28, %cst_15 {dimension_numbers = #tpu.dot_dimension_numbers<[1], [0], [0], [1], [0, 0, 1, 1], [], []>} : vector<8x128xf32>, vector<128x128xf32>, vector<8x128xf32> -> vector<8x128xf32>
    %30 = arith.addf %27, %29 : vector<8x128xf32>
    %c0_16 = arith.constant 0 : index
    %c0_17 = arith.constant 0 : index
    %31 = vector.load %arg13[%c0_16, %c0_17] : memref<8x128xf32, #tpu.memory_space<vmem>>, vector<8x128xf32>
    tpu.vector_store %arg13[%c0_16, %c0_17], %30 {strides = array<i32>} : memref<8x128xf32, #tpu.memory_space<vmem>>, vector<8x128xf32>,
    %c0_i32_18 = arith.constant 0 : i32
    %32 = arith.cmpi eq, %arg1, %c0_i32_18 : i32
    %33 = arith.extui %32 : i1 to i32
    %c0_i32_19 = arith.constant 0 : i32
    %34 = arith.cmpi ne, %33, %c0_i32_19 : i32
    scf.if %34 {
      %c0_20 = arith.constant 0 : index
      %c0_21 = arith.constant 0 : index
      %35 = vector.load %arg14[%c0_20, %c0_21] : memref<8x384xf32, #tpu.memory_space<vmem>>, vector<8x128xf32>
      %c0_22 = arith.constant 0 : index
      %c256 = arith.constant 256 : index
      %36 = vector.load %arg14[%c0_22, %c256] : memref<8x384xf32, #tpu.memory_space<vmem>>, vector<8x128xf32>
      %c0_23 = arith.constant 0 : index
      %c0_24 = arith.constant 0 : index
      %37 = vector.load %arg12[%c0_23, %c0_24] : memref<8x128xf32, #tpu.memory_space<vmem>>, vector<8x128xf32>
      %c0_25 = arith.constant 0 : index
      %c0_26 = arith.constant 0 : index
      %38 = vector.load %arg7[%c0_25, %c0_26] : memref<128x128xf32, #tpu.memory_space<vmem>>, vector<128x128xf32>
      %cst_27 = arith.constant dense<0.000000e+00> : vector<8x128xf32>
      %39 = tpu.matmul %37, %38, %cst_27 {dimension_numbers = #tpu.dot_dimension_numbers<[1], [0], [0], [1], [0, 0, 1, 1], [], []>} : vector<8x128xf32>, vector<128x128xf32>, vector<8x128xf32> -> vector<8x128xf32>
      %c0_28 = arith.constant 0 : index
      %c0_29 = arith.constant 0 : index
      %40 = vector.load %arg8[%c0_28, %c0_29] : memref<1x128xf32, #tpu.memory_space<vmem>>, vector<1x128xf32>
      %41 = vector.broadcast %40 : vector<1x128xf32> to vector<8x128xf32>
      %42 = arith.addf %39, %41 : vector<8x128xf32>
      %43 = arith.addf %42, %35 : vector<8x128xf32>
      %44 = arith.negf %43 : vector<8x128xf32>
      %45 = math.exp %44 : vector<8x128xf32>
      %cst_30 = arith.constant 1.000000e+00 : f32
      %46 = vector.broadcast %cst_30 : f32 to vector<8x128xf32>
      %47 = arith.addf %46, %45 : vector<8x128xf32>
      %48 = arith.divf %46, %47 : vector<8x128xf32>
      %c0_31 = arith.constant 0 : index
      %c0_32 = arith.constant 0 : index
      %49 = vector.load %arg13[%c0_31, %c0_32] : memref<8x128xf32, #tpu.memory_space<vmem>>, vector<8x128xf32>
      %c0_33 = arith.constant 0 : index
      %c0_34 = arith.constant 0 : index
      %50 = vector.load %arg9[%c0_33, %c0_34] : memref<128x128xf32, #tpu.memory_space<vmem>>, vector<128x128xf32>
      %cst_35 = arith.constant dense<0.000000e+00> : vector<8x128xf32>
      %51 = tpu.matmul %49, %50, %cst_35 {dimension_numbers = #tpu.dot_dimension_numbers<[1], [0], [0], [1], [0, 0, 1, 1], [], []>} : vector<8x128xf32>, vector<128x128xf32>, vector<8x128xf32> -> vector<8x128xf32>
      %c0_36 = arith.constant 0 : index
      %c0_37 = arith.constant 0 : index
      %52 = vector.load %arg10[%c0_36, %c0_37] : memref<1x128xf32, #tpu.memory_space<vmem>>, vector<1x128xf32>
      %53 = vector.broadcast %52 : vector<1x128xf32> to vector<8x128xf32>
      %54 = arith.addf %51, %53 : vector<8x128xf32>
      %55 = arith.addf %54, %36 : vector<8x128xf32>
      %56 = math.tanh %55 : vector<8x128xf32>
      %cst_38 = arith.constant 1.000000e+00 : f32
      %57 = vector.broadcast %cst_38 : f32 to vector<8x128xf32>
      %58 = arith.subf %57, %48 : vector<8x128xf32>
      %59 = arith.mulf %58, %37 : vector<8x128xf32>
      %60 = arith.mulf %48, %56 : vector<8x128xf32>
      %61 = arith.addf %59, %60 : vector<8x128xf32>
      %c0_39 = arith.constant 0 : index
      %c0_40 = arith.constant 0 : index
      %62 = vector.load %arg11[%c0_39, %c0_40] : memref<8x128xf32, #tpu.memory_space<vmem>>, vector<8x128xf32>
      tpu.vector_store %arg11[%c0_39, %c0_40], %61 {strides = array<i32>} : memref<8x128xf32, #tpu.memory_space<vmem>>, vector<8x128xf32>,
    } else {
    }
    return
  }
  func.func @transform_0(%arg0: i32, %arg1: i32) -> (i32, i32) {
    %c0_i32 = arith.constant 0 : i32
    %c0_i32_0 = arith.constant 0 : i32
    return %c0_i32, %arg1 : i32, i32
  }
  func.func @transform_1(%arg0: i32, %arg1: i32) -> (i32, i32) {
    %c0_i32 = arith.constant 0 : i32
    %c0_i32_0 = arith.constant 0 : i32
    return %arg0, %c0_i32 : i32, i32
  }
  func.func @transform_2(%arg0: i32, %arg1: i32) -> (i32, i32) {
    %c0_i32 = arith.constant 0 : i32
    %c0_i32_0 = arith.constant 0 : i32
    return %arg1, %c0_i32 : i32, i32
  }
  func.func @transform_3(%arg0: i32, %arg1: i32) -> (i32, i32) {
    %c0_i32 = arith.constant 0 : i32
    %c0_i32_0 = arith.constant 0 : i32
    return %arg1, %c0_i32 : i32, i32
  }
  func.func @transform_4(%arg0: i32, %arg1: i32) -> (i32, i32) {
    %c0_i32 = arith.constant 0 : i32
    %c0_i32_0 = arith.constant 0 : i32
    %c0_i32_1 = arith.constant 0 : i32
    return %c0_i32, %c0_i32_0 : i32, i32
  }
  func.func @transform_5(%arg0: i32, %arg1: i32) -> (i32, i32) {
    %c0_i32 = arith.constant 0 : i32
    %c0_i32_0 = arith.constant 0 : i32
    %c0_i32_1 = arith.constant 0 : i32
    return %c0_i32, %c0_i32_0 : i32, i32
  }
  func.func @transform_6(%arg0: i32, %arg1: i32) -> (i32, i32) {
    %c0_i32 = arith.constant 0 : i32
    %c0_i32_0 = arith.constant 0 : i32
    %c0_i32_1 = arith.constant 0 : i32
    return %c0_i32, %c0_i32_0 : i32, i32
  }
  func.func @transform_7(%arg0: i32, %arg1: i32) -> (i32, i32) {
    %c0_i32 = arith.constant 0 : i32
    %c0_i32_0 = arith.constant 0 : i32
    %c0_i32_1 = arith.constant 0 : i32
    return %c0_i32, %c0_i32_0 : i32, i32
  }
  func.func @transform_8(%arg0: i32, %arg1: i32) -> (i32, i32) {
    %c0_i32 = arith.constant 0 : i32
    %c0_i32_0 = arith.constant 0 : i32
    %c0_i32_1 = arith.constant 0 : i32
    return %c0_i32, %c0_i32_0 : i32, i32
  }
  func.func @transform_9(%arg0: i32, %arg1: i32) -> (i32, i32) {
    %c0_i32 = arith.constant 0 : i32
    %c0_i32_0 = arith.constant 0 : i32
    return %arg0, %c0_i32 : i32, i32
  }
}

</mosaic_0001>

<bundles_post_ra>
// kernel: tpu_custom_call.1
= control target key start
LH: loop header
LB: loop body
LE: loop exit
PB: predicated region body
PF: predicated region fallthrough
CT: control target
= control target key end

     0   :  { %14 = vsyncpa [#allocation6], 0  ;;  %s2199_s0 = inlined_call_operand.hbm [shape: s32[1,128], index: 0, kind: input, shape index: {}]   ;;  %s2200_s1 = inlined_call_operand.hbm [shape: f32[8,128], index: 1, kind: input, shape index: {}]   ;;  %s2201_s2 = inlined_call_operand.hbm [shape: f32[128,128], index: 2, kind: input, shape index: {}]   ;;  %s2202_s3 = inlined_call_operand.hbm [shape: f32[128,128], index: 3, kind: input, shape index: {}]   ;;  %s2203_s4 = inlined_call_operand.hbm [shape: f32[128,384], index: 4, kind: input, shape index: {}]   ;;  %s2204_s5 = inlined_call_operand.hbm [shape: f32[128,128], index: 5, kind: input, shape index: {}]   ;;  %s2205_s6 = inlined_call_operand.vmem [shape: f32[1,128], index: 6, kind: input, shape index: {}]   ;;  %s2206_s7 = inlined_call_operand.hbm [shape: f32[128,128], index: 7, kind: input, shape index: {}]   ;;  %s2207_s8 = inlined_call_operand.vmem [shape: f32[1,128], index: 8, kind: input, shape index: {}]   ;;  %s2208_s9 = inlined_call_operand.hbm [shape: f32[8,128], index: 9, kind: output, shape index: {}]  }
   0x1   :  { %15 = vsyncpa [#allocation9], 0 }
   0x2   :  { %16 = vsyncpa [#allocation12], 0 }
   0x3   :  { %17 = vsyncpa [#allocation15], 0 }
   0x4   :  { %18 = vsyncpa [#allocation7], 0  ;;  %s1863_s30 = smov [#allocation8]   ;;  %s1677_s13 = scalar_lea.hbm %s2200_s1, 128 }
   0x5   :  { %s35_s10 = sshll.u32 %s1863_s30, 4  ;;  %p1678_p0 = scmp.ne.s32.totalorder %s2200_s1, %s1677_s13  ;;  %s36_s10 = int_to_ptr.vmem [resolvable:$true] %s35_s10 }
   0x6   :  { %p1681_p1 = scmp.lt.u32.totalorder %s1677_s13, %s2200_s1 }
   0x8   :  { %p1683_p2 = pnand %p1681_p1, %p1678_p0 }
   0xa   :  { %1686 = shalt.err (!%p1683_p2)
}
   0xb   :  { %s1687_s18 = scalar_lea.vmem %s36_s10, 128  ;;  %p1692_p4 = scmp.lt.s32.totalorder %s36_s10, %s36_s10 }
   0xc   :  { %p1688_p3 = scmp.ne.s32.totalorder %s36_s10, %s1687_s18  ;;  %p1693_p5 = scmp.lt.s32.totalorder %s1687_s18, %s1687_s18 }
   0xe   :  { %p1694_p6 = por %p1693_p5, %p1692_p4 }
  0x10   :  { %p1695_p7 = pnand %p1694_p6, %p1688_p3 }
  0x12   :  { %1698 = shalt.err (!%p1695_p7)
}
  0x13   :  { %38 = dma.hbm_to_vmem [thread:$0]  %s2200_s1, 128, %s36_s10, [#allocation9]  }
  0x14   :  { %s1864_s21 = smov [#allocation11]   ;;  %s1865_s23 = smov [#allocation14]  }
  0x15   :  { %s56_s22 = sshll.u32 %s1864_s21, 4  ;;  %s80_s24 = sshll.u32 %s1865_s23, 4  ;;  %s57_s22 = int_to_ptr.vmem [resolvable:$true] %s56_s22  ;;  %s81_s24 = int_to_ptr.vmem [resolvable:$true] %s80_s24 }
  0x16   :  { %s1699_s27 = scalar_lea.hbm %s2202_s3, 2048 }
  0x17   :  { %p1700_p8 = scmp.ne.s32.totalorder %s2202_s3, %s1699_s27  ;;  %p1703_p9 = scmp.lt.u32.totalorder %s1699_s27, %s2202_s3 }
  0x19   :  { %p1705_p10 = pnand %p1703_p9, %p1700_p8 }
  0x1b   :  { %1708 = shalt.err (!%p1705_p10)
}
  0x1c   :  { %s1709_s1 = scalar_lea.vmem %s57_s22, 2048  ;;  %p1714_p12 = scmp.lt.s32.totalorder %s57_s22, %s57_s22 }
  0x1d   :  { %p1710_p11 = scmp.ne.s32.totalorder %s57_s22, %s1709_s1  ;;  %p1715_p13 = scmp.lt.s32.totalorder %s1709_s1, %s1709_s1 }
  0x1f   :  { %p1716_p0 = por %p1715_p13, %p1714_p12 }
  0x21   :  { %p1717_p1 = pnand %p1716_p0, %p1710_p11 }
  0x23   :  { %1720 = shalt.err (!%p1717_p1)
}
  0x24   :  { %s1866_s10 = smov 128   ;;  %s1867_s12 = smov 8  }
  0x25   :  { %62 = dma.hbm_to_vmem [thread:$0]  %s2202_s3, 2048, %s57_s22, [#allocation12], %s1866_s10, %s1866_s10, %s1867_s12  }
  0x26   :  { %s1721_s17 = scalar_lea.hbm %s2204_s5, 2048 }
  0x27   :  { %p1722_p2 = scmp.ne.s32.totalorder %s2204_s5, %s1721_s17  ;;  %p1725_p3 = scmp.lt.u32.totalorder %s1721_s17, %s2204_s5 }
  0x29   :  { %p1727_p4 = pnand %p1725_p3, %p1722_p2 }
  0x2b   :  { %1730 = shalt.err (!%p1727_p4)
}
  0x2c   :  { %s1731_s23 = scalar_lea.vmem %s81_s24, 2048  ;;  %p1736_p6 = scmp.lt.s32.totalorder %s81_s24, %s81_s24 }
  0x2d   :  { %p1732_p5 = scmp.ne.s32.totalorder %s81_s24, %s1731_s23  ;;  %p1737_p7 = scmp.lt.s32.totalorder %s1731_s23, %s1731_s23 }
  0x2f   :  { %p1738_p8 = por %p1737_p7, %p1736_p6 }
  0x31   :  { %p1739_p9 = pnand %p1738_p8, %p1732_p5 }
  0x33   :  { %1742 = shalt.err (!%p1739_p9)
}
  0x34   :  { %86 = dma.hbm_to_vmem [thread:$0]  %s2204_s5, 2048, %s81_s24, [#allocation15], %s1866_s10, %s1866_s10, %s1867_s12  }
  0x35   :  { %s1868_s25 = smov [#allocation5]   ;;  %s1869_s27 = smov [#allocation10]  }
  0x36   :  { %s25_s26 = sshll.u32 %s1868_s25, 4  ;;  %s44_s28 = sshll.u32 %s1869_s27, 4  ;;  %s26_s26 = int_to_ptr.vmem [resolvable:$true] %s25_s26  ;;  %s45_s28 = int_to_ptr.vmem [resolvable:$true] %s44_s28 }
  0x37   :  { %s1743_s11 = scalar_lea.hbm %s2199_s0, 16 }
  0x38   :  { %p1744_p10 = scmp.ne.s32.totalorder %s2199_s0, %s1743_s11  ;;  %p1747_p11 = scmp.lt.u32.totalorder %s1743_s11, %s2199_s0 }
  0x3a   :  { %p1749_p12 = pnand %p1747_p11, %p1744_p10 }
  0x3c   :  { %1752 = shalt.err (!%p1749_p12)
}
  0x3d   :  { %s1753_s5 = scalar_lea.vmem %s26_s26, 16  ;;  %s1757_s24 = scalar_lea.vmem %s26_s26, 32 }
  0x3e   :  { %p1754_p13 = scmp.ne.s32.totalorder %s26_s26, %s1753_s5  ;;  %p1758_p0 = scmp.lt.s32.totalorder %s26_s26, %s26_s26 }
  0x3f   :  { %p1759_p1 = scmp.lt.s32.totalorder %s1757_s24, %s1753_s5 }
  0x41   :  { %p1760_p2 = por %p1759_p1, %p1758_p0 }
  0x43   :  { %p1761_p3 = pnand %p1760_p2, %p1754_p13 }
  0x45   :  { %1764 = shalt.err (!%p1761_p3)
}
  0x46   :  { %28 = dma.hbm_to_vmem [thread:$0]  %s2199_s0, 16, %s26_s26, [#allocation6]  }
  0x47   :  { %s1765_s20 = scalar_lea.hbm %s2201_s2, 2048 }
  0x48   :  { %p1766_p4 = scmp.ne.s32.totalorder %s2201_s2, %s1765_s20  ;;  %p1769_p5 = scmp.lt.u32.totalorder %s1765_s20, %s2201_s2 }
  0x4a   :  { %p1771_p6 = pnand %p1769_p5, %p1766_p4 }
  0x4c   :  { %1774 = shalt.err (!%p1771_p6)
}
  0x4d   :  { %s1775_s25 = scalar_lea.vmem %s45_s28, 2048  ;;  %p1780_p8 = scmp.lt.s32.totalorder %s45_s28, %s45_s28 }
  0x4e   :  { %p1776_p7 = scmp.ne.s32.totalorder %s45_s28, %s1775_s25  ;;  %p1781_p9 = scmp.lt.s32.totalorder %s1775_s25, %s1775_s25 }
  0x50   :  { %p1782_p10 = por %p1781_p9, %p1780_p8 }
  0x52   :  { %p1783_p11 = pnand %p1782_p10, %p1776_p7 }
  0x54   :  { %1786 = shalt.err (!%p1783_p11)
}
  0x55   :  { %50 = dma.hbm_to_vmem [thread:$0]  %s2201_s2, 2048, %s45_s28, [#allocation9], %s1866_s10, %s1866_s10, %s1867_s12  }
  0x56   :  { %s1870_s27 = smov [#allocation13]   ;;  %s1787_s1 = scalar_lea.hbm %s2203_s4, 6144 }
  0x57   :  { %s68_s29 = sshll.u32 %s1870_s27, 4  ;;  %p1788_p12 = scmp.ne.s32.totalorder %s2203_s4, %s1787_s1  ;;  %s69_s29 = int_to_ptr.vmem [resolvable:$true] %s68_s29 }
  0x58   :  { %p1791_p13 = scmp.lt.u32.totalorder %s1787_s1, %s2203_s4 }
  0x5a   :  { %p1793_p0 = pnand %p1791_p13, %p1788_p12 }
  0x5c   :  { %1796 = shalt.err (!%p1793_p0)
}
  0x5d   :  { %s1797_s24 = scalar_lea.vmem %s69_s29, 6144  ;;  %p1802_p2 = scmp.lt.s32.totalorder %s69_s29, %s69_s29 }
  0x5e   :  { %p1798_p1 = scmp.ne.s32.totalorder %s69_s29, %s1797_s24  ;;  %p1803_p3 = scmp.lt.s32.totalorder %s1797_s24, %s1797_s24 }
  0x60   :  { %p1804_p4 = por %p1803_p3, %p1802_p2 }
  0x62   :  { %p1805_p5 = pnand %p1804_p4, %p1798_p1 }
  0x64   :  { %1808 = shalt.err (!%p1805_p5)
}
  0x65   :  { %s1871_s2 = smov 384   ;;  %s1872_s28 = smov 24  }
  0x66   :  { %74 = dma.hbm_to_vmem [thread:$0]  %s2203_s4, 6144, %s69_s29, [#allocation12], %s1871_s2, %s1871_s2, %s1872_s28  }
  0x67   :  { %s1873_s18 = smov [#allocation16]   ;;  %s1809_s23 = scalar_lea.hbm %s2206_s7, 2048 }
  0x68   :  { %s94_s19 = sshll.u32 %s1873_s18, 4  ;;  %p1810_p6 = scmp.ne.s32.totalorder %s2206_s7, %s1809_s23  ;;  %s95_s19 = int_to_ptr.vmem [resolvable:$true] %s94_s19 }
  0x69   :  { %p1813_p7 = scmp.lt.u32.totalorder %s1809_s23, %s2206_s7 }
  0x6b   :  { %p1815_p8 = pnand %p1813_p7, %p1810_p6 }
  0x6d   :  { %1818 = shalt.err (!%p1815_p8)
}
  0x6e   :  { %s1819_s26 = scalar_lea.vmem %s95_s19, 2048  ;;  %p1824_p10 = scmp.lt.s32.totalorder %s95_s19, %s95_s19 }
  0x6f   :  { %p1820_p9 = scmp.ne.s32.totalorder %s95_s19, %s1819_s26  ;;  %p1825_p11 = scmp.lt.s32.totalorder %s1819_s26, %s1819_s26 }
  0x71   :  { %p1826_p12 = por %p1825_p11, %p1824_p10 }
  0x73   :  { %p1827_p13 = pnand %p1826_p12, %p1820_p9 }
  0x75   :  { %1830 = shalt.err (!%p1827_p13)
}
  0x76   :  { %100 = dma.hbm_to_vmem [thread:$0]  %s2206_s7, 2048, %s95_s19, [#allocation15], %s1866_s10, %s1866_s10, %s1867_s12  }
  0x77   :  { %1853 = dma.done.wait [#allocation6], 16  }
  0x78   :  { %1854 = vsyncadd [#allocation6], 4294967280 }
  0x79   :  { %1855 = dma.done.wait [#allocation9], 2176  }
  0x7a   :  { %1856 = vsyncadd [#allocation9], 4294965120 }
  0x7b   :  { %1857 = dma.done.wait [#allocation12], 8192  }
  0x7c   :  { %1858 = vsyncadd [#allocation12], 4294959104 }
  0x7d   :  { %1859 = dma.done.wait [#allocation15], 4096  }
  0x7e   :  { %1860 = vsyncadd [#allocation15], 4294963200  ;;  %v1874_v0 = vmov 0.0   ;;  %v1875_v1 = vmov 0.0|0.0   ;;  %vm1876_vm0 = vmmov 0   ;;  %v132_v2 = vld [vmem:[#allocation13 + $0x8] sm:$0xff]  ;;  %v324_v25 = vlaneseq }
  0x7f   :  { %243 = vmatprep.mubr.f32.mxu0 %v1874_v0  ;;  %1468 = vmatprep.subr.bf16.mxu1 %v1875_v1  ;;  %v135_v3 = vld [vmem:[#allocation13 + $0x20] sm:$0xff]  ;;  %v134_v6 = vld [vmem:[#allocation13 + $0x18] sm:$0xff]  ;;  %v141_v8 = vld [vmem:[#allocation13 + $0x50] sm:$0xff]  ;;  %vm458_vm2 = vcmask 64512   ;;  %s1878_s29 = smov [#allocation17]  }
  0x80   :  { %1267 = vmatprep.mubr.msk.f32.mxu1 %vm1876_vm0, %v1874_v0  ;;  %v131_v4 = vld [vmem:[#allocation13] sm:$0xff]  ;;  %v1436_v5 = vpack.c.bf16 %v135_v3, %v132_v2  ;;  %v138_v7 = vld [vmem:[#allocation13 + $0x38] sm:$0xff]  ;;  %v137_v11 = vld [vmem:[#allocation13 + $0x30] sm:$0xff]  ;;  %v2029_v32 = vshrl.u32 %v324_v25, 7  ;;  %s1082_s30 = sshll.u32 %s1878_s29, 4  ;;  %s1083_s30 = int_to_ptr.vmem [resolvable:$true] %s1082_s30 }
  0x81   :  { %v1438_v9 = vpack.c.bf16 %v134_v6, %v131_v4  ;;  %v1440_v10 = vpack.c.bf16 %v141_v8, %v138_v7  ;;  %v140_v12 = vld [vmem:[#allocation13 + $0x48] sm:$0xff]  ;;  %v147_v14 = vld [vmem:[#allocation13 + $0x80] sm:$0xff]  ;;  %v146_v18 = vld [vmem:[#allocation13 + $0x78] sm:$0xff]  ;;  %s1831_s11 = scalar_lea.vmem %s1083_s30, 128  ;;  %p1836_p1 = scmp.lt.s32.totalorder %s1083_s30, %s1083_s30 }
  0x82   :  { %v144_v13 = vld [vmem:[#allocation13 + $0x68] sm:$0xff]  ;;  %1437 = vmatprep.subr.bf16.mxu0 %v1436_v5  ;;  %v1442_v15 = vpack.c.bf16 %v140_v12, %v137_v11  ;;  %v143_v17 = vld [vmem:[#allocation13 + $0x60] sm:$0xff]  ;;  %v150_v19 = vld [vmem:[#allocation13 + $0x98] sm:$0xff]  ;;  %p1832_p0 = scmp.ne.s32.totalorder %s1083_s30, %s1831_s11  ;;  %p1837_p2 = scmp.lt.s32.totalorder %s1831_s11, %s1831_s11 }
  0x83   :  { %1439 = vmatpush1.bf16.msra.mxu0 %v1438_v9  ;;  %v1444_v16 = vpack.c.bf16 %v147_v14, %v144_v13  ;;  %v153_v20 = vld [vmem:[#allocation13 + $0xb0] sm:$0xff]  ;;  %v1446_v21 = vpack.c.bf16 %v146_v18, %v143_v17  ;;  %v152_v24 = vld [vmem:[#allocation13 + $0xa8] sm:$0xff]  ;;  %v159_v27 = vld [vmem:[#allocation13 + $0xe0] sm:$0xff] }
  0x84   :  { %1441 = vmatprep.subr.bf16.mxu0 %v1440_v10  ;;  %v1448_v22 = vpack.c.bf16 %v153_v20, %v150_v19  ;;  %v149_v23 = vld [vmem:[#allocation13 + $0x90] sm:$0xff]  ;;  %v156_v26 = vld [vmem:[#allocation13 + $0xc8] sm:$0xff]  ;;  %v155_v30 = vld [vmem:[#allocation13 + $0xc0] sm:$0xff]  ;;  %p1838_p3 = por %p1837_p2, %p1836_p1 }
  0x85   :  { %v1450_v28 = vpack.c.bf16 %v152_v24, %v149_v23  ;;  %v1452_v29 = vpack.c.bf16 %v159_v27, %v156_v26  ;;  %v158_v31 = vld [vmem:[#allocation13 + $0xd8] sm:$0xff]  ;;  %v165_v34 = vld [vmem:[#allocation13 + $0x110] sm:$0xff]  ;;  %v164_v37 = vld [vmem:[#allocation13 + $0x108] sm:$0xff] }
  0x86   :  { %v162_v33 = vld [vmem:[#allocation13 + $0xf8] sm:$0xff]  ;;  %v161_v35 = vld [vmem:[#allocation13 + $0xf0] sm:$0xff]  ;;  %v1454_v36 = vpack.c.bf16 %v158_v31, %v155_v30  ;;  %v136_v41 = vld [vmem:[#allocation13 + $0x28] sm:$0xff]  ;;  %p1839_p4 = pnand %p1838_p3, %p1832_p0 }
  0x87   :  { %1443 = vmatpush1.bf16.msra.mxu0 %v1442_v15  ;;  %v2031_v38 = vld [vmem:[#allocation5] ss:$0 sm:$0xff]  ;;  %v1456_v40 = vpack.c.bf16 %v165_v34, %v162_v33  ;;  %v139_v42 = vld [vmem:[#allocation13 + $0x40] sm:$0xff]  ;;  %v142_v43 = vld [vmem:[#allocation13 + $0x58] sm:$0xff]  ;;  %v1458_v48 = vpack.c.bf16 %v164_v37, %v161_v35 }
  0x88   :  { %1445 = vmatprep.subr.bf16.mxu0 %v1444_v16  ;;  %v133_v39 = vld [vmem:[#allocation13 + $0x10] sm:$0xff]  ;;  %vm333_vm1 = vcmp.eq.s32.totalorder %v2031_v38, %v2029_v32  ;;  %v168_v44 = vld [vmem:[#allocation13 + $0x128] sm:$0xff]  ;;  %v171_v45 = vld [vmem:[#allocation13 + $0x140] sm:$0xff]  ;;  %v1472_v50 = vpack.c.bf16 %v142_v43, %v139_v42  ;;  %v1877_v43 = vmov 1.0  }
  0x89   :  { %v1095_v46 = vsel %vm333_vm1, 1.0, %v1874_v0  ;;  %v1469_v47 = vpack.c.bf16 %v136_v41, %v133_v39  ;;  %v167_v49 = vld [vmem:[#allocation13 + $0x120] sm:$0xff]  ;;  %v1460_v51 = vpack.c.bf16 %v171_v45, %v168_v44  ;;  %v170_v52 = vld [vmem:[#allocation13 + $0x138] sm:$0xff]  ;;  %v145_v53 = vld [vmem:[#allocation13 + $0x70] sm:$0xff] }
  0x8a   :  { %426 = vxpose.xlu0.b32.start.end [1/1] (short) %v1095_v46, 128  ;;  %v148_v54 = vld [vmem:[#allocation13 + $0x88] sm:$0xff]  ;;  %v174_v55 = vld [vmem:[#allocation13 + $0x158] sm:$0xff]  ;;  %v177_v56 = vld [vmem:[#allocation13 + $0x170] sm:$0xff]  ;;  %v1462_v57 = vpack.c.bf16 %v170_v52, %v167_v49 }
  0x8b   :  { %1447 = vmatpush1.bf16.msra.mxu0 %v1446_v21  ;;  %1470 = vmatpush3.bf16.msra.mxu1 %v1469_v47  ;;  %v173_v58 = vld [vmem:[#allocation13 + $0x150] sm:$0xff]  ;;  %v1475_v59 = vpack.c.bf16 %v148_v54, %v145_v53  ;;  %v1464_v60 = vpack.c.bf16 %v177_v56, %v174_v55  ;;  %v176_v61 = vld [vmem:[#allocation13 + $0x168] sm:$0xff]  ;;  %v151_v62 = vld [vmem:[#allocation13 + $0xa0] sm:$0xff] }
  0x8c   :  { %1449 = vmatprep.subr.bf16.mxu0 %v1448_v22  ;;  %1471 = vmatprep.subr.bf16.mxu1 %v1875_v1  ;;  %v154_v63 = vld [vmem:[#allocation13 + $0xb8] sm:$0xff]  ;;  %v1466_v2 = vpack.c.bf16 %v176_v61, %v173_v58  ;;  %v2041_v4 = vld [vmem:[#allocation10] sm:$0xff]  ;;  %v2043_v5 = vld [vmem:[#allocation10 + $0x8] sm:$0xff] }
  0x8d   :  { %v1478_v3 = vpack.c.bf16 %v154_v63, %v151_v62  ;;  %v157_v6 = vld [vmem:[#allocation13 + $0xd0] sm:$0xff]  ;;  %v160_v7 = vld [vmem:[#allocation13 + $0xe8] sm:$0xff]  ;;  %v130_v8 = vld [vmem:[#allocation8] sm:$0xff]  ;;  %v1493_v9 = vpack.c.bf16 %v2043_v5, %v2041_v4 }
  0x8e   :  { %v2049_v10 = vld [vmem:[#allocation10 + $0x10] sm:$0xff]  ;;  %v2051_v11 = vld [vmem:[#allocation10 + $0x18] sm:$0xff]  ;;  %v1481_v12 = vpack.c.bf16 %v160_v7, %v157_v6  ;;  %v163_v13 = vld [vmem:[#allocation13 + $0x100] sm:$0xff] }
  0x8f   :  { %1451 = vmatpush1.bf16.msra.mxu0 %v1450_v28  ;;  %1473 = vmatpush3.bf16.msra.mxu1 %v1472_v50  ;;  %v166_v14 = vld [vmem:[#allocation13 + $0x118] sm:$0xff]  ;;  %v1496_v15 = vpack.c.bf16 %v2051_v11, %v2049_v10  ;;  %v2059_v16 = vld [vmem:[#allocation10 + $0x20] sm:$0xff]  ;;  %v2061_v17 = vld [vmem:[#allocation10 + $0x28] sm:$0xff] }
  0x90   :  { %1453 = vmatprep.subr.bf16.mxu0 %v1452_v29  ;;  %1474 = vmatprep.subr.bf16.mxu1 %v1875_v1  ;;  %v1484_v18 = vpack.c.bf16 %v166_v14, %v163_v13  ;;  %v169_v19 = vld [vmem:[#allocation13 + $0x130] sm:$0xff]  ;;  %v172_v20 = vld [vmem:[#allocation13 + $0x148] sm:$0xff]  ;;  %v1499_v21 = vpack.c.bf16 %v2061_v17, %v2059_v16  ;;  %v2069_v23 = vld [vmem:[#allocation10 + $0x38] sm:$0xff] }
  0x91   :  { %v2067_v22 = vld [vmem:[#allocation10 + $0x30] sm:$0xff]  ;;  %v1487_v24 = vpack.c.bf16 %v172_v20, %v169_v19  ;;  %v175_v25 = vld [vmem:[#allocation13 + $0x160] sm:$0xff]  ;;  %v178_v26 = vld [vmem:[#allocation13 + $0x178] sm:$0xff] }
  0x92   :  { %v1502_v27 = vpack.c.bf16 %v2069_v23, %v2067_v22  ;;  %v2075_v28 = vld [vmem:[#allocation10 + $0x40] sm:$0xff]  ;;  %v2077_v29 = vld [vmem:[#allocation10 + $0x48] sm:$0xff]  ;;  %v1490_v30 = vpack.c.bf16 %v178_v26, %v175_v25  ;;  %v2083_v33 = vld [vmem:[#allocation10 + $0x50] sm:$0xff] }
  0x93   :  { %1455 = vmatpush1.bf16.msra.mxu0 %v1454_v36  ;;  %1476 = vmatpush3.bf16.msra.mxu1 %v1475_v59  ;;  %v1505_v31 = vpack.c.bf16 %v2077_v29, %v2075_v28  ;;  %v2085_v34 = vld [vmem:[#allocation10 + $0x58] sm:$0xff]  ;;  %v2090_v36 = vld [vmem:[#allocation10 + $0x60] sm:$0xff]  ;;  %v2092_v37 = vld [vmem:[#allocation10 + $0x68] sm:$0xff] }
  0x94   :  { %1457 = vmatprep.subr.bf16.mxu0 %v1456_v40  ;;  %1477 = vmatprep.subr.bf16.mxu1 %v1875_v1  ;;  %v1508_v35 = vpack.c.bf16 %v2085_v34, %v2083_v33  ;;  %v1511_v39 = vpack.c.bf16 %v2092_v37, %v2090_v36  ;;  %v2097_v40 = vld [vmem:[#allocation10 + $0x70] sm:$0xff]  ;;  %v2099_v41 = vld [vmem:[#allocation10 + $0x78] sm:$0xff]  ;;  %v875_v44 = vld [vmem:[#allocation14] sm:$0xff] }
  0x95   :  { %v1514_v42 = vpack.c.bf16 %v2099_v41, %v2097_v40  ;;  %v876_v45 = vld [vmem:[#allocation14 + $0x8] sm:$0xff]  ;;  %v877_v47 = vld [vmem:[#allocation14 + $0x10] sm:$0xff]  ;;  %v879_v50 = vld [vmem:[#allocation14 + $0x20] sm:$0xff] }
  0x96   :  { %v1541_v46 = vpack.c.bf16 %v876_v45, %v875_v44  ;;  %v881_v53 = vld [vmem:[#allocation14 + $0x30] sm:$0xff]  ;;  %v882_v54 = vld [vmem:[#allocation14 + $0x38] sm:$0xff]  ;;  %v883_v56 = vld [vmem:[#allocation14 + $0x40] sm:$0xff] }
  0x97   :  { %1459 = vmatpush1.bf16.msra.mxu0 %v1458_v48  ;;  %1479 = vmatpush3.bf16.msra.mxu1 %v1478_v3  ;;  %v878_v48 = vld [vmem:[#allocation14 + $0x18] sm:$0xff]  ;;  %v1550_v55 = vpack.c.bf16 %v882_v54, %v881_v53  ;;  %v885_v59 = vld [vmem:[#allocation14 + $0x50] sm:$0xff]  ;;  %v887_v62 = vld [vmem:[#allocation14 + $0x60] sm:$0xff] }
  0x98   :  { %1461 = vmatprep.subr.bf16.mxu0 %v1460_v51  ;;  %1480 = vmatprep.subr.bf16.mxu1 %v1875_v1  ;;  %v1544_v49 = vpack.c.bf16 %v878_v48, %v877_v47  ;;  %v880_v51 = vld [vmem:[#allocation14 + $0x28] sm:$0xff]  ;;  %v889_v3 = vld [vmem:[#allocation14 + $0x70] sm:$0xff]  ;;  %v890_v6 = vld [vmem:[#allocation14 + $0x78] sm:$0xff] }
  0x99   :  { %v1547_v52 = vpack.c.bf16 %v880_v51, %v879_v50  ;;  %v888_v63 = vld [vmem:[#allocation14 + $0x68] sm:$0xff]  ;;  %v1562_v7 = vpack.c.bf16 %v890_v6, %v889_v3  ;;  %v655_v51 = vld [vmem:[#allocation11 + $0x18] sm:$0xff]  ;;  %v654_v53 = vld [vmem:[#allocation11 + $0x10] sm:$0xff] }
  0x9a   :  { %v653_v45 = vld [vmem:[#allocation11 + $0x8] sm:$0xff]  ;;  %v984_v32 = vld [vmem:[#allocation16 + $0x40] sm:$0xff] }
  0x9b   :  { %1463 = vmatpush1.bf16.msra.mxu0 %v1462_v57  ;;  %1482 = vmatpush3.bf16.msra.mxu1 %v1481_v12  ;;  %v884_v57 = vld [vmem:[#allocation14 + $0x48] sm:$0xff] }
  0x9c   :  { %1465 = vmatprep.subr.bf16.mxu0 %v1464_v60  ;;  %1483 = vmatprep.subr.bf16.mxu1 %v1875_v1  ;;  %v1553_v58 = vpack.c.bf16 %v884_v57, %v883_v56  ;;  %v886_v60 = vld [vmem:[#allocation14 + $0x58] sm:$0xff]  ;;  %v985_v38 = vld [vmem:[#allocation16 + $0x48] sm:$0xff] }
  0x9d   :  { %v1556_v61 = vpack.c.bf16 %v886_v60, %v885_v59  ;;  %v657_v59 = vld [vmem:[#allocation11 + $0x28] sm:$0xff] }
  0x9f   :  { %1467 = vmatpush1.bf16.msra.mxu0 %v1466_v2  ;;  %1485 = vmatpush3.bf16.msra.mxu1 %v1484_v18  ;;  %v1559_v2 = vpack.c.bf16 %v888_v63, %v887_v62 }
  0xa0   :  { %1492 = vmatprep.subr.bf16.mxu0 %v1875_v1  ;;  %1486 = vmatprep.subr.bf16.mxu1 %v1875_v1 }
  0xa2   :  { %244 = vmatmul.mubr.f32.vlgmr.msra.gmra.mrb[0].mxu0 %v130_v8 }
  0xa3   :  { %1494 = vmatpush3.bf16.msra.mxu0 %v1493_v9  ;;  %1302 = vmatprep.mubr.msk.f32.mxu0 %vm1876_vm0, %v1874_v0 }
  0xa4   :  { %1495 = vmatprep.subr.bf16.mxu0 %v1875_v1  ;;  %1488 = vmatpush3.bf16.msra.mxu1 %v1487_v24 }
  0xa5   :  { %1489 = vmatprep.subr.bf16.mxu1 %v1875_v1 }
  0xa7   :  { %1497 = vmatpush3.bf16.msra.mxu0 %v1496_v15 }
  0xa8   :  { %1498 = vmatprep.subr.bf16.mxu0 %v1875_v1  ;;  %1491 = vmatpush3.bf16.msra.mxu1 %v1490_v30 }
  0xab   :  { %1500 = vmatpush3.bf16.msra.mxu0 %v1499_v21  ;;  %1268 = vmatmul.mubr.f32.vlgmr.msra.gmra.mrb[0].mxu1 %v130_v8 }
  0xac   :  { %1501 = vmatprep.subr.bf16.mxu0 %v1875_v1 }
  0xaf   :  { %1503 = vmatpush3.bf16.msra.mxu0 %v1502_v27 }
  0xb0   :  { %1504 = vmatprep.subr.bf16.mxu0 %v1875_v1 }
  0xb3   :  { %1506 = vmatpush3.bf16.msra.mxu0 %v1505_v31 }
  0xb4   :  { %1507 = vmatprep.subr.bf16.mxu0 %v1875_v1 }
  0xb7   :  { %1509 = vmatpush3.bf16.msra.mxu0 %v1508_v35 }
  0xb8   :  { %1510 = vmatprep.subr.bf16.mxu0 %v1875_v1 }
  0xbb   :  { %1512 = vmatpush3.bf16.msra.mxu0 %v1511_v39 }
  0xbc   :  { %1513 = vmatprep.subr.bf16.mxu0 %v1875_v1 }
  0xbf   :  { %1515 = vmatpush3.bf16.msra.mxu0 %v1514_v42 }
  0xc0   :  { %1540 = vmatprep.subr.bf16.mxu0 %v1875_v1 }
  0xc2   :  { %1303 = vmatmul.mubr.msk.f32.vlgmr.msra.gmra.mrb[2].mxu0 %vm333_vm1, %v1877_v43 }
  0xc3   :  { %1398 = vmatprep.mubr.msk.f32.mxu0 %vm1876_vm0, %v1874_v0  ;;  %1542 = vmatpush3.bf16.msra.mxu0 %v1541_v46  ;;  %v652_v46 = vld [vmem:[#allocation11] sm:$0xff] }
  0xc4   :  { %1543 = vmatprep.subr.bf16.mxu0 %v1875_v1 }
  0xc7   :  { %1545 = vmatpush3.bf16.msra.mxu0 %v1544_v49 }
  0xc8   :  { %1546 = vmatprep.subr.bf16.mxu0 %v1875_v1 }
  0xcb   :  { %1548 = vmatpush3.bf16.msra.mxu0 %v1547_v52 }
  0xcc   :  { %1549 = vmatprep.subr.bf16.mxu0 %v1875_v1 }
  0xcf   :  { %1551 = vmatpush3.bf16.msra.mxu0 %v1550_v55 }
  0xd0   :  { %1552 = vmatprep.subr.bf16.mxu0 %v1875_v1 }
  0xd3   :  { %1554 = vmatpush3.bf16.msra.mxu0 %v1553_v58 }
  0xd4   :  { %1555 = vmatprep.subr.bf16.mxu0 %v1875_v1 }
  0xd7   :  { %1557 = vmatpush3.bf16.msra.mxu0 %v1556_v61  ;;  %v656_v61 = vld [vmem:[#allocation11 + $0x20] sm:$0xff] }
  0xd8   :  { %1558 = vmatprep.subr.bf16.mxu0 %v1875_v1 }
  0xdb   :  { %1560 = vmatpush3.bf16.msra.mxu0 %v1559_v2 }
  0xdc   :  { %1561 = vmatprep.subr.bf16.mxu0 %v1875_v1 }
  0xdf   :  { %1563 = vmatpush3.bf16.msra.mxu0 %v1562_v7  ;;  %v659_v7 = vld [vmem:[#allocation11 + $0x38] sm:$0xff] }
 0x10a   :  { %v442_v8 = vpop.trf.xlu0 }
 0x10b   :  { %1307 = vmatprep.mubr.msk.f32.mxu1 %vm458_vm2, %v442_v8 }
 0x10e   :  { %v443_v9 = vpop.trf.xlu0 }
 0x112   :  { %v444_v12 = vpop.trf.xlu0 }
 0x116   :  { %v445_v13 = vpop.trf.xlu0 }
 0x11a   :  { %v446_v14 = vpop.trf.xlu0 }
 0x11e   :  { %v447_v15 = vpop.trf.xlu0 }
 0x122   :  { %v448_v18 = vpop.trf.xlu0 }
 0x126   :  { %v449_v19 = vpop.trf.xlu0 }
 0x12a   :  { %v450_v20 = vpop.trf.xlu0 }
 0x12e   :  { %v451_v21 = vpop.trf.xlu0 }
 0x132   :  { %v452_v24 = vpop.trf.xlu0 }
 0x136   :  { %v453_v27 = vpop.trf.xlu0 }
 0x13a   :  { %v454_v30 = vpop.trf.xlu0 }
 0x13e   :  { %v455_v31 = vpop.trf.xlu0 }
 0x142   :  { %v456_v35 = vpop.trf.xlu0 }
 0x146   :  { %v457_v39 = vpop.trf.xlu0 }
 0x175   :  { %v2119_v25 = vpop.f32.mrb[0].mxu0 }
 0x176   :  { %v247_v26 = vpop.f32.mrb[1].mxu0 }
 0x177   :  { %1305 = vmatprep.subr.mxu1 %v247_v26 }
 0x178   :  { %1306 = vmatpush3.msra.mxu1 %v247_v26 }
 0x179   :  { %1308 = vmatmul.mubr.msk.f32.vlgmr.msra.gmra.mrb[2].mxu1 %vm458_vm2, %v443_v9  ;;  %1516 = vmatprep.subr.bf16.mxu1 %v1875_v1  ;;  %v658_v9 = vld [vmem:[#allocation11 + $0x30] sm:$0xff] }
 0x17a   :  { %1310 = vmatprep.mubr.msk.f32.mxu1 %vm458_vm2, %v444_v12 }
 0x17d   :  { %1311 = vmatmul.mubr.msk.f32.gmra.mrb[4].mxu1 %vm458_vm2, %v445_v13 }
 0x17e   :  { %1313 = vmatprep.mubr.msk.f32.mxu1 %vm458_vm2, %v446_v14 }
 0x181   :  { %1314 = vmatmul.mubr.msk.f32.gmra.mrb[6].mxu1 %vm458_vm2, %v447_v15 }
 0x182   :  { %1316 = vmatprep.mubr.msk.f32.mxu1 %vm458_vm2, %v448_v18 }
 0x185   :  { %1317 = vmatmul.mubr.msk.f32.gmra.mrb[8].mxu1 %vm458_vm2, %v449_v19  ;;  %v661_v19 = vld [vmem:[#allocation11 + $0x48] sm:$0xff] }
 0x186   :  { %1319 = vmatprep.mubr.msk.f32.mxu1 %vm458_vm2, %v450_v20 }
 0x189   :  { %1320 = vmatmul.mubr.msk.f32.gmra.mrb[10].mxu1 %vm458_vm2, %v451_v21 }
 0x18a   :  { %1322 = vmatprep.mubr.msk.f32.mxu1 %vm458_vm2, %v452_v24  ;;  %v660_v24 = vld [vmem:[#allocation11 + $0x40] sm:$0xff] }
 0x18d   :  { %1323 = vmatmul.mubr.msk.f32.gmra.mrb[12].mxu1 %vm458_vm2, %v453_v27 }
 0x18e   :  { %1325 = vmatprep.mubr.msk.f32.mxu1 %vm458_vm2, %v454_v30 }
 0x191   :  { %1326 = vmatmul.mubr.msk.f32.gmra.mrb[14].mxu1 %vm458_vm2, %v455_v31 }
 0x192   :  { %1328 = vmatprep.mubr.msk.f32.mxu1 %vm458_vm2, %v456_v35 }
 0x195   :  { %v2136_v42 = vpop.f32.mrb[2].mxu0  ;;  %1329 = vmatmul.mubr.msk.f32.gmra.mrb[16].mxu1 %vm458_vm2, %v457_v39 }
 0x196   :  { %1399 = vmatmul.mubr.f32.vlgmr.msra.gmra.mrb[4].mxu0 %v2136_v42  ;;  %v1304_v44 = vpop.f32.mrb[3].mxu0  ;;  %1363 = vmatprep.mubr.msk.f32.mxu1 %vm1876_vm0, %v1874_v0 }
 0x24c   :  { %v1309_v47 = vpop.f32.mrb[2].mxu1 }
 0x24d   :  { %v669_v48 = vadd.f32 %v1309_v47, %v653_v45  ;;  %v573_v49 = vpop.f32.mrb[3].mxu1 }
 0x24e   :  { %v668_v50 = vadd.f32 %v652_v46, %v573_v49  ;;  %v663_v46 = vld [vmem:[#allocation11 + $0x58] sm:$0xff]  ;;  %v662_v49 = vld [vmem:[#allocation11 + $0x50] sm:$0xff] }
 0x24f   :  { %v1114_v52 = vmul.f32 -1.442695, %v669_v48 }
 0x250   :  { %v1113_v54 = vmul.f32 -1.442695, %v668_v50  ;;  %v1312_v55 = vpop.f32.mrb[4].mxu1 }
 0x251   :  { %1607 = vpow2.f32 %v1114_v52  ;;  %v671_v56 = vadd.f32 %v1312_v55, %v655_v51  ;;  %v583_v57 = vpop.f32.mrb[5].mxu1 }
 0x252   :  { %1609 = vpow2.f32 %v1113_v54  ;;  %v670_v58 = vadd.f32 %v654_v53, %v583_v57 }
 0x253   :  { %v1116_v60 = vmul.f32 -1.442695, %v671_v56 }
 0x254   :  { %v1115_v62 = vmul.f32 -1.442695, %v670_v58  ;;  %v1315_v63 = vpop.f32.mrb[6].mxu1  ;;  %v665_v58 = vld [vmem:[#allocation11 + $0x68] sm:$0xff] }
 0x255   :  { %1611 = vpow2.f32 %v1116_v60  ;;  %v673_v2 = vadd.f32 %v1315_v63, %v657_v59  ;;  %v593_v3 = vpop.f32.mrb[7].mxu1 }
 0x256   :  { %1613 = vpow2.f32 %v1115_v62  ;;  %v672_v6 = vadd.f32 %v656_v61, %v593_v3  ;;  %v664_v61 = vld [vmem:[#allocation11 + $0x60] sm:$0xff] }
 0x257   :  { %v1118_v8 = vmul.f32 -1.442695, %v673_v2 }
 0x258   :  { %v1117_v12 = vmul.f32 -1.442695, %v672_v6  ;;  %v1318_v13 = vpop.f32.mrb[8].mxu1 }
 0x259   :  { %1615 = vpow2.f32 %v1118_v8  ;;  %v675_v14 = vadd.f32 %v1318_v13, %v659_v7  ;;  %v603_v15 = vpop.f32.mrb[9].mxu1 }
 0x25a   :  { %1617 = vpow2.f32 %v1117_v12  ;;  %v674_v18 = vadd.f32 %v658_v9, %v603_v15  ;;  %v667_v12 = vld [vmem:[#allocation11 + $0x78] sm:$0xff]  ;;  %v666_v15 = vld [vmem:[#allocation11 + $0x70] sm:$0xff] }
 0x25b   :  { %v1608_v20 = vpop.eup %1607  ;;  %v1120_v21 = vmul.f32 -1.442695, %v675_v14 }
 0x25c   :  { %v1610_v26 = vpop.eup %1609  ;;  %v733_v27 = vadd.f32 1.0, %v1608_v20  ;;  %v1119_v30 = vmul.f32 -1.442695, %v674_v18  ;;  %v1321_v31 = vpop.f32.mrb[10].mxu1  ;;  %v1130_v18 = vld [vmem:[%s2205_s6] ss:$0 sm:$0xff] }
 0x25d   :  { %v732_v35 = vadd.f32 1.0, %v1610_v26  ;;  %1619 = vpow2.f32 %v1120_v21  ;;  %v677_v39 = vadd.f32 %v1321_v31, %v661_v19  ;;  %v613_v44 = vpop.f32.mrb[11].mxu1 }
 0x25e   :  { %1621 = vrcp.f32 %v733_v27  ;;  %v676_v45 = vadd.f32 %v660_v24, %v613_v44 }
 0x25f   :  { %v1612_v47 = vpop.eup %1611  ;;  %1623 = vrcp.f32 %v732_v35  ;;  %v1122_v48 = vmul.f32 -1.442695, %v677_v39 }
 0x260   :  { %v1614_v50 = vpop.eup %1613  ;;  %v735_v51 = vadd.f32 1.0, %v1612_v47  ;;  %1625 = vpow2.f32 %v1119_v30  ;;  %v1121_v52 = vmul.f32 -1.442695, %v676_v45  ;;  %v1324_v53 = vpop.f32.mrb[12].mxu1 }
 0x261   :  { %v734_v54 = vadd.f32 1.0, %v1614_v50  ;;  %1627 = vpow2.f32 %v1122_v48  ;;  %v679_v55 = vadd.f32 %v1324_v53, %v663_v46  ;;  %v623_v56 = vpop.f32.mrb[13].mxu1 }
 0x262   :  { %1629 = vrcp.f32 %v735_v51  ;;  %v678_v57 = vadd.f32 %v662_v49, %v623_v56 }
 0x263   :  { %v1616_v59 = vpop.eup %1615  ;;  %1631 = vrcp.f32 %v734_v54  ;;  %v1124_v60 = vmul.f32 -1.442695, %v679_v55 }
 0x264   :  { %v1618_v62 = vpop.eup %1617  ;;  %v737_v63 = vadd.f32 1.0, %v1616_v59  ;;  %1633 = vpow2.f32 %v1121_v52  ;;  %v1123_v2 = vmul.f32 -1.442695, %v678_v57  ;;  %v1327_v3 = vpop.f32.mrb[14].mxu1 }
 0x265   :  { %v736_v6 = vadd.f32 1.0, %v1618_v62  ;;  %1635 = vpow2.f32 %v1124_v60  ;;  %v681_v7 = vadd.f32 %v1327_v3, %v665_v58  ;;  %v633_v8 = vpop.f32.mrb[15].mxu1 }
 0x266   :  { %1637 = vrcp.f32 %v737_v63  ;;  %v680_v9 = vadd.f32 %v664_v61, %v633_v8 }
 0x267   :  { %v1620_v13 = vpop.eup %1619  ;;  %1639 = vrcp.f32 %v736_v6  ;;  %v1126_v14 = vmul.f32 -1.442695, %v681_v7 }
 0x268   :  { %v1622_v19 = vpop.eup %1621  ;;  %v739_v20 = vadd.f32 1.0, %v1620_v13  ;;  %1641 = vpow2.f32 %v1123_v2  ;;  %v1125_v21 = vmul.f32 -1.442695, %v680_v9  ;;  %v1330_v24 = vpop.f32.mrb[16].mxu1 }
 0x269   :  { %v1624_v26 = vpop.eup %1623  ;;  %1643 = vpow2.f32 %v1126_v14  ;;  %v683_v27 = vadd.f32 %v1330_v24, %v667_v12  ;;  %v643_v30 = vpop.f32.mrb[17].mxu1  ;;  %v782_v35 = vmul.f32 %v1622_v19, %v2043_v5 }
 0x26a   :  { %v964_v31 = vpop.f32.mrb[4].mxu0  ;;  %v1626_v39 = vpop.eup %1625  ;;  %1645 = vrcp.f32 %v739_v20  ;;  %v682_v44 = vadd.f32 %v666_v15, %v643_v30  ;;  %v781_v46 = vmul.f32 %v1624_v26, %v2041_v4 }
 0x26b   :  { %v965_v45 = vadd.f32 %v1130_v18, %v964_v31  ;;  %v1400_v47 = vpop.f32.mrb[5].mxu0  ;;  %v1628_v48 = vpop.eup %1627  ;;  %v738_v49 = vadd.f32 1.0, %v1626_v39  ;;  %1647 = vpow2.f32 %v1125_v21  ;;  %v1128_v50 = vmul.f32 -1.442695, %v683_v27 }
 0x26c   :  { %v1630_v51 = vpop.eup %1629  ;;  %v741_v52 = vadd.f32 1.0, %v1628_v48  ;;  %v1127_v53 = vmul.f32 -1.442695, %v682_v44  ;;  %v1517_v55 = vpack.c.bf16 %v782_v35, %v781_v46 }
 0x26d   :  { %v968_v54 = vadd.f32 %v965_v45, %v2119_v25  ;;  %v1632_v56 = vpop.eup %1631  ;;  %1649 = vrcp.f32 %v738_v49  ;;  %v784_v5 = vmul.f32 %v1630_v51, %v2051_v11 }
 0x26e   :  { %v1634_v57 = vpop.eup %1633  ;;  %1651 = vrcp.f32 %v741_v52  ;;  %1518 = vmatpush3.bf16.msra.mxu1 %v1517_v55  ;;  %v783_v4 = vmul.f32 %v1632_v56, %v2049_v10  ;;  %v978_v56 = vld [vmem:[#allocation16 + $0x10] sm:$0xff] }
 0x26f   :  { %v1636_v58 = vpop.eup %1635  ;;  %v740_v59 = vadd.f32 1.0, %v1634_v57  ;;  %1653 = vpow2.f32 %v1128_v50  ;;  %v1131_v60 = vmul.f32 -1.442695, %v968_v54  ;;  %1519 = vmatprep.subr.bf16.mxu1 %v1875_v1 }
 0x270   :  { %v1638_v61 = vpop.eup %1637  ;;  %v743_v62 = vadd.f32 1.0, %v1636_v58  ;;  %1655 = vpow2.f32 %v1127_v53  ;;  %v1520_v25 = vpack.c.bf16 %v784_v5, %v783_v4  ;;  %v977_v53 = vld [vmem:[#allocation16 + $0x8] sm:$0xff]  ;;  %v979_v5 = vld [vmem:[#allocation16 + $0x18] sm:$0xff] }
 0x271   :  { %v1640_v63 = vpop.eup %1639  ;;  %1657 = vrcp.f32 %v740_v59  ;;  %v786_v2 = vmul.f32 %v1638_v61, %v2061_v17  ;;  %v981_v4 = vld [vmem:[#allocation16 + $0x28] sm:$0xff]  ;;  %v982_v59 = vld [vmem:[#allocation16 + $0x30] sm:$0xff]  ;;  %v987_v61 = vld [vmem:[#allocation16 + $0x58] sm:$0xff] }
 0x272   :  { %v1642_v11 = vpop.eup %1641  ;;  %1659 = vrcp.f32 %v743_v62  ;;  %1521 = vmatpush3.bf16.msra.mxu1 %v1520_v25  ;;  %v785_v3 = vmul.f32 %v1640_v63, %v2059_v16  ;;  %v988_v25 = vld [vmem:[#allocation16 + $0x60] sm:$0xff]  ;;  %v989_v63 = vld [vmem:[#allocation16 + $0x68] sm:$0xff] }
 0x273   :  { %v1644_v10 = vpop.eup %1643  ;;  %v742_v6 = vadd.f32 1.0, %v1642_v11  ;;  %1661 = vpow2.f32 %v1131_v60  ;;  %1522 = vmatprep.subr.bf16.mxu1 %v1875_v1  ;;  %v990_v11 = vld [vmem:[#allocation16 + $0x70] sm:$0xff] }
 0x274   :  { %v1646_v7 = vpop.eup %1645  ;;  %v745_v8 = vadd.f32 1.0, %v1644_v10  ;;  %v1523_v9 = vpack.c.bf16 %v786_v2, %v785_v3  ;;  %v1583_v2 = vpack.c.bf16 %v989_v63, %v988_v25  ;;  %v991_v3 = vld [vmem:[#allocation16 + $0x78] sm:$0xff] }
 0x275   :  { %v1648_v12 = vpop.eup %1647  ;;  %1663 = vrcp.f32 %v742_v6  ;;  %v788_v17 = vmul.f32 %v1646_v7, %v2069_v23  ;;  %v1586_v10 = vpack.c.bf16 %v991_v3, %v990_v11 }
 0x276   :  { %1665 = vrcp.f32 %v745_v8  ;;  %v744_v13 = vadd.f32 1.0, %v1648_v12  ;;  %1524 = vmatpush3.bf16.msra.mxu1 %v1523_v9  ;;  %v1132_v8 = vld [vmem:[%s2207_s8] ss:$0 sm:$0xff] }
 0x277   :  { %v1650_v14 = vpop.eup %1649  ;;  %1525 = vmatprep.subr.bf16.mxu1 %v1875_v1 }
 0x278   :  { %v1652_v15 = vpop.eup %1651  ;;  %1667 = vrcp.f32 %v744_v13  ;;  %v787_v16 = vmul.f32 %v1650_v14, %v2067_v22 }
 0x279   :  { %v1654_v18 = vpop.eup %1653  ;;  %v790_v24 = vmul.f32 %v1652_v15, %v2077_v29 }
 0x27a   :  { %v1656_v19 = vpop.eup %1655  ;;  %v747_v20 = vadd.f32 1.0, %v1654_v18  ;;  %v1526_v21 = vpack.c.bf16 %v788_v17, %v787_v16 }
 0x27b   :  { %v1658_v26 = vpop.eup %1657  ;;  %v746_v27 = vadd.f32 1.0, %v1656_v19 }
 0x27c   :  { %v1660_v30 = vpop.eup %1659  ;;  %1669 = vrcp.f32 %v747_v20  ;;  %1527 = vmatpush3.bf16.msra.mxu1 %v1526_v21  ;;  %v789_v23 = vmul.f32 %v1658_v26, %v2075_v28 }
 0x27d   :  { %v1662_v31 = vpop.eup %1661  ;;  %1671 = vrcp.f32 %v746_v27  ;;  %1528 = vmatprep.subr.bf16.mxu1 %v1875_v1  ;;  %v792_v22 = vmul.f32 %v1660_v30, %v2085_v34 }
 0x27e   :  { %v972_v35 = vadd.f32 1.0, %v1662_v31  ;;  %v1529_v39 = vpack.c.bf16 %v790_v24, %v789_v23 }
 0x27f   :  { %v1664_v44 = vpop.eup %1663 }
 0x280   :  { %v1666_v45 = vpop.eup %1665  ;;  %1673 = vrcp.f32 %v972_v35  ;;  %1530 = vmatpush3.bf16.msra.mxu1 %v1529_v39  ;;  %v791_v29 = vmul.f32 %v1664_v44, %v2083_v33  ;;  %v976_v33 = vld [vmem:[#allocation16] sm:$0xff] }
 0x281   :  { %1531 = vmatprep.subr.bf16.mxu1 %v1875_v1  ;;  %v794_v46 = vmul.f32 %v1666_v45, %v2092_v37 }
 0x282   :  { %v1668_v47 = vpop.eup %1667  ;;  %v1532_v28 = vpack.c.bf16 %v792_v22, %v791_v29 }
 0x283   :  { %v793_v48 = vmul.f32 %v1668_v47, %v2090_v36  ;;  %v1565_v36 = vpack.c.bf16 %v977_v53, %v976_v33 }
 0x284   :  { %1533 = vmatpush3.bf16.msra.mxu1 %v1532_v28 }
 0x285   :  { %1534 = vmatprep.subr.bf16.mxu1 %v1875_v1  ;;  %v1535_v49 = vpack.c.bf16 %v794_v46, %v793_v48 }
 0x286   :  { %v1670_v50 = vpop.eup %1669 }
 0x287   :  { %v1672_v34 = vpop.eup %1671  ;;  %v796_v51 = vmul.f32 %v1670_v50, %v2099_v41  ;;  %v980_v41 = vld [vmem:[#allocation16 + $0x20] sm:$0xff] }
 0x288   :  { %1536 = vmatpush3.bf16.msra.mxu1 %v1535_v49  ;;  %v795_v52 = vmul.f32 %v1672_v34, %v2097_v40  ;;  %v1568_v40 = vpack.c.bf16 %v979_v5, %v978_v56  ;;  %v1571_v58 = vpack.c.bf16 %v981_v4, %v980_v41 }
 0x289   :  { %1537 = vmatprep.subr.bf16.mxu1 %v1875_v1 }
 0x28a   :  { %v1674_v37 = vpop.eup %1673  ;;  %v1538_v54 = vpack.c.bf16 %v796_v51, %v795_v52 }
 0x28b   :  { %v1071_v55 = vsub.f32 1.0, %v1674_v37 }
 0x28c   :  { %1539 = vmatpush3.bf16.msra.mxu1 %v1538_v54 }
 0x28d   :  { %1564 = vmatprep.subr.bf16.mxu1 %v1875_v1  ;;  %v1072_v57 = vmul.f32 %v1071_v55, %v2136_v42  ;;  %v983_v42 = vld [vmem:[#allocation16 + $0x38] sm:$0xff] }
 0x28e   :  { %v1574_v60 = vpack.c.bf16 %v983_v42, %v982_v59 }
 0x28f   :  { %1364 = vmatmul.mubr.msk.f32.vlgmr.msra.gmra.mrb[18].mxu1 %vm333_vm1, %v1877_v43  ;;  %v1577_v43 = vpack.c.bf16 %v985_v38, %v984_v32 }
 0x290   :  { %1566 = vmatpush3.bf16.msra.mxu1 %v1565_v36  ;;  %1433 = vmatprep.mubr.msk.f32.mxu1 %vm1876_vm0, %v1874_v0  ;;  %v986_v0 = vld [vmem:[#allocation16 + $0x50] sm:$0xff] }
 0x291   :  { %1567 = vmatprep.subr.bf16.mxu1 %v1875_v1  ;;  %v1580_v62 = vpack.c.bf16 %v987_v61, %v986_v0 }
 0x294   :  { %1569 = vmatpush3.bf16.msra.mxu1 %v1568_v40 }
 0x295   :  { %1570 = vmatprep.subr.bf16.mxu1 %v1875_v1 }
 0x298   :  { %1572 = vmatpush3.bf16.msra.mxu1 %v1571_v58 }
 0x299   :  { %1573 = vmatprep.subr.bf16.mxu1 %v1875_v1 }
 0x29c   :  { %1575 = vmatpush3.bf16.msra.mxu1 %v1574_v60 }
 0x29d   :  { %1576 = vmatprep.subr.bf16.mxu1 %v1875_v1 }
 0x2a0   :  { %1578 = vmatpush3.bf16.msra.mxu1 %v1577_v43 }
 0x2a1   :  { %1579 = vmatprep.subr.bf16.mxu1 %v1875_v1 }
 0x2a4   :  { %1581 = vmatpush3.bf16.msra.mxu1 %v1580_v62 }
 0x2a5   :  { %1582 = vmatprep.subr.bf16.mxu1 %v1875_v1 }
 0x2a8   :  { %1584 = vmatpush3.bf16.msra.mxu1 %v1583_v2 }
 0x2a9   :  { %1585 = vmatprep.subr.bf16.mxu1 %v1875_v1 }
 0x2ac   :  { %1587 = vmatpush3.bf16.msra.mxu1 %v1586_v10 }
 0x362   :  { %v863_v6 = vpop.f32.mrb[18].mxu1 }
 0x363   :  { %1434 = vmatmul.mubr.f32.vlgmr.msra.gmra.mrb[0].mxu1 %v863_v6  ;;  %v1365_v7 = vpop.f32.mrb[19].mxu1 }
 0x436   :  { %v1065_v9 = vpop.f32.mrb[0].mxu1 }
 0x437   :  { %v1066_v12 = vadd.f32 %v1132_v8, %v1065_v9  ;;  %v1435_v13 = vpop.f32.mrb[1].mxu1 }
 0x439   :  { %1675 = vtanh.f32 %v1066_v12 }
 0x443   :  { %v1676_v17 = vpop.eup %1675 }
 0x444   :  { %v1073_v14 = vmul.f32 %v1676_v17, %v1674_v37 }
 0x446   :  { %v1074_v15 = vadd.f32 %v1073_v14, %v1072_v57 }
 0x448   :  { %1075 = vst [vmem:[#allocation17] sm:$0xff] %v1074_v15 }
 0x449   :  { %1842 = shalt.err (!%p1839_p4)
}
 0x44a   :  { %s1843_s13 = scalar_lea.hbm %s2208_s9, 128 }
 0x44b   :  { %p1844_p5 = scmp.ne.s32.totalorder %s2208_s9, %s1843_s13  ;;  %p1847_p6 = scmp.lt.u32.totalorder %s1843_s13, %s2208_s9 }
 0x44d   :  { %p1849_p7 = pnand %p1847_p6, %p1844_p5 }
 0x44f   :  { %1852 = shalt.err (!%p1849_p7)
}
 0x450   :  { %1085 = dma.vmem_to_hbm [thread:$0]  %s1083_s30, 128, %s2208_s9, [#allocation7]  }
 0x451   :  { %1861 = dma.done.wait [#allocation7], 128  }
 0x452   :  { %1862 = vsyncadd [#allocation7], 4294967168 }
 0x453   :  { %1089 = vsyncpa [#allocation6], 1 }
 0x454   :  { %1090 = vsyncpa [#allocation9], 1 }
 0x455   :  { %1091 = vsyncpa [#allocation12], 1 }
 0x456   :  { %1092 = vsyncpa [#allocation15], 1 }
 0x457   :  { %1093 = vsyncpa [#allocation7], 1 }

</bundles_post_ra>
